<compile_context>
chip_gen: v5e
topology: v5e:2x2
jax: 0.10.0
libtpu: 0.0.40
codegen_flags: <defaults>
</compile_context>

<pallas_src>
import functools

import jax
import jax.numpy as jnp
from jax.experimental import pallas as pl
from jax.experimental.pallas import tpu as pltpu


def _round_up(v, m):
    return pl.cdiv(v, m) * m


def _gaussian_mlp_kernel(*refs, n_inputs, out_dim):
    """Fused mu+logvar MLP forward on packed weights.

    Ref layout (inputs..., then output):
      x_0 .. x_{n-1}                       per-arg activation tiles [tm, d_i]
      w1_0 .. w1_{n-1}, b1                 layer 1 (W1 split per input arg)
      (w_l, b_l) for remaining layers      packed (block-diagonal) layers
      out                                  [tm, n_pad] lane-dense output slab
    """
    x_refs = refs[:n_inputs]
    w1_refs = refs[n_inputs:2 * n_inputs]
    b1_ref = refs[2 * n_inputs]
    layer_refs = refs[2 * n_inputs + 1:-1]
    out_ref = refs[-1]

    # Layer 1: in-kernel "hstack" == sum of per-arg partial matmuls (MXU).
    acc = jnp.dot(x_refs[0][...], w1_refs[0][...],
                  preferred_element_type=jnp.float32)
    for x_ref, w_ref in zip(x_refs[1:], w1_refs[1:]):
        acc = acc + jnp.dot(x_ref[...], w_ref[...],
                            preferred_element_type=jnp.float32)
    y = jnp.maximum(acc + b1_ref[...], 0.0)                      # ReLU (VPU)

    # Remaining layers: [hidden ReLU]* then the linear output layer.
    n_rest = len(layer_refs) // 2
    for li in range(n_rest):
        w_ref = layer_refs[2 * li]
        b_ref = layer_refs[2 * li + 1]
        y = jnp.dot(y, w_ref[...], preferred_element_type=jnp.float32) + b_ref[...]
        if li < n_rest - 1:
            y = jnp.maximum(y, 0.0)                              # ReLU (VPU)

    # Stable softplus applied only to the logvar half (columns [out_dim, 2*out_dim)).
    col = jax.lax.broadcasted_iota(jnp.int32, y.shape, 1)
    is_logvar = (col >= out_dim) & (col < 2 * out_dim)
    softplus = jnp.maximum(y, 0.0) + jnp.log1p(jnp.exp(-jnp.abs(y)))   # EUP exp/log
    out_ref[...] = jnp.where(is_logvar, softplus, y).astype(out_ref.dtype)


def _block_diag(a, b):
    ra, ca = a.shape
    rb, cb = b.shape
    top = jnp.concatenate([a, jnp.zeros((ra, cb), a.dtype)], axis=1)
    bot = jnp.concatenate([jnp.zeros((rb, ca), b.dtype), b], axis=1)
    return jnp.concatenate([top, bot], axis=0)


def pack_gaussian_mlp(params_mu, params_logvar, input_splits, lane_pad=128):
    """Pack the mu / logvar networks into one network (done once, outside the hot path)."""
    n_layers = len(params_mu) // 2
    out_dim = int(params_mu[f"w{n_layers}"].shape[1])

    # Layer 1: concat along the hidden dim; split along the input dim per arg so the
    # hstack of args happens inside the kernel as partial matmuls.
    w1 = jnp.concatenate([params_mu["w1"], params_logvar["w1"]], axis=1)
    b1 = jnp.concatenate([params_mu["b1"], params_logvar["b1"]], axis=1)
    w1_parts, off = [], 0
    for d in input_splits:
        w1_parts.append(w1[off:off + d, :])
        off += d
    assert off == w1.shape[0], "input_splits must sum to the MLP input_dim"

    # Deeper layers: block-diagonal packing keeps the two branches independent.
    layers = []
    for li in range(2, n_layers + 1):
        w = _block_diag(params_mu[f"w{li}"], params_logvar[f"w{li}"])
        b = jnp.concatenate([params_mu[f"b{li}"], params_logvar[f"b{li}"]], axis=1)
        layers.append((w, b))

    # Lane-dense output: zero-pad the final layer's columns to a multiple of 128.
    n_out2 = 2 * out_dim
    n_pad = _round_up(max(n_out2, lane_pad), lane_pad)
    w_last, b_last = layers[-1]
    layers[-1] = (jnp.pad(w_last, ((0, 0), (0, n_pad - n_out2))),
                  jnp.pad(b_last, ((0, 0), (0, n_pad - n_out2))))

    return {"w1_parts": w1_parts, "b1": b1, "layers": layers,
            "out_dim": out_dim, "n_pad": n_pad}


def gaussian_mlp_forward(packed, *args, block_rows=512):
    """Single fused pallas_call returning (mu, softplus(logvar))."""
    xs = [jnp.asarray(a, jnp.float32) for a in args]
    assert len(xs) == len(packed["w1_parts"]), "number of args must match packing"
    batch = xs[0].shape[0]
    out_dim, n_pad = packed["out_dim"], packed["n_pad"]

    # Batch tiling: a single full block for small batches; (tm)-row blocks otherwise.
    tm = min(block_rows, _round_up(batch, 8))
    bp = _round_up(batch, tm)
    if bp != batch:
        xs = [jnp.pad(x, ((0, bp - batch), (0, 0))) for x in xs]

    operands = list(xs) + list(packed["w1_parts"]) + [packed["b1"]]
    for w, b in packed["layers"]:
        operands += [w, b]

    in_specs = []
    for x in xs:
        in_specs.append(pl.BlockSpec((tm, x.shape[1]), lambda i: (i, 0)))
    for op in operands[len(xs):]:                      # weights/biases: full, resident
        in_specs.append(pl.BlockSpec(op.shape, lambda i: (0, 0)))
    out_spec = pl.BlockSpec((tm, n_pad), lambda i: (i, 0))

    flops = 2 * bp * (sum(w.shape[0] * w.shape[1] for w in packed["w1_parts"])
                      + sum(w.shape[0] * w.shape[1] for w, _ in packed["layers"]))
    bytes_accessed = 4 * (sum(int(x.size) for x in xs)
                          + sum(int(op.size) for op in operands[len(xs):])
                          + bp * n_pad)
    cost = pl.CostEstimate(flops=int(flops),
                           transcendentals=int(bp * n_pad),
                           bytes_accessed=int(bytes_accessed))

    kernel = functools.partial(_gaussian_mlp_kernel,
                               n_inputs=len(xs), out_dim=out_dim)

    out = pl.pallas_call(
        kernel,
        out_shape=jax.ShapeDtypeStruct((bp, n_pad), jnp.float32),
        grid=(bp // tm,),
        in_specs=in_specs,
        out_specs=out_spec,
        compiler_params=pltpu.CompilerParams(dimension_semantics=("parallel",)),
        cost_estimate=cost,
    )(*operands)

    out = out[:batch]
    return out[:, :out_dim], out[:, out_dim:2 * out_dim]


def init_mlp_params(key, input_dim, hidden_dims, output_dim):
    """Deterministic synthetic init (shapes match the nn.Linear stack)."""
    dims = [input_dim] + list(hidden_dims) + [output_dim]
    params = {}
    for i, (din, dout) in enumerate(zip(dims[:-1], dims[1:]), start=1):
        key, kw, kb = jax.random.split(key, 3)
        scale = 1.0 / jnp.sqrt(jnp.float32(din))
        params[f"w{i}"] = jax.random.normal(kw, (din, dout), jnp.float32) * scale
        params[f"b{i}"] = jax.random.normal(kb, (1, dout), jnp.float32) * 0.01
    return params


def _reference_forward(params_mu, params_logvar, *args):
    x = jnp.concatenate([jnp.asarray(a, jnp.float32) for a in args], axis=-1)

    def mlp(p):
        n_layers = len(p) // 2
        h = x
        for i in range(1, n_layers):
            h = jnp.maximum(h @ p[f"w{i}"] + p[f"b{i}"], 0.0)
        return h @ p[f"w{n_layers}"] + p[f"b{n_layers}"]

    return mlp(params_mu), jax.nn.softplus(mlp(params_logvar))


if __name__ == "__main__":
    # small shapes consistent with the module: batch=8, two input modalities of
    # 16 and 8 features (hstacked -> input_dim=24), hidden_dims=(32, 32), output_dim=8
    batch, x1_dim, x2_dim = 8, 16, 8
    hidden_dims, output_dim = (32, 32), 8
    input_dim = x1_dim + x2_dim

    key = jax.random.PRNGKey(0)
    k1, k2, k_mu, k_lv = jax.random.split(key, 4)
    x1 = jax.random.normal(k1, (batch, x1_dim), jnp.float32)
    x2 = jax.random.normal(k2, (batch, x2_dim), jnp.float32)

    params_mu = init_mlp_params(k_mu, input_dim, hidden_dims, output_dim)
    params_lv = init_mlp_params(k_lv, input_dim, hidden_dims, output_dim)

    packed = pack_gaussian_mlp(params_mu, params_lv, input_splits=(x1_dim, x2_dim))

    mu, var = gaussian_mlp_forward(packed, x1, x2)
    mu, var = jax.block_until_ready(mu), jax.block_until_ready(var)

    ref_mu, ref_var = _reference_forward(params_mu, params_lv, x1, x2)
    assert mu.shape == (batch, output_dim) and var.shape == (batch, output_dim)
    assert jnp.allclose(mu, ref_mu, atol=1e-4, rtol=1e-4)
    assert jnp.allclose(var, ref_var, atol=1e-4, rtol=1e-4)
    assert bool(jnp.all(var >= 0.0))  # softplus output is non-negative

    # secondary check: exercise the batch grid (grid > 1) with a small block size
    b2 = 24
    ky = jax.random.fold_in(key, 7)
    y1 = jax.random.normal(jax.random.fold_in(ky, 0), (b2, x1_dim), jnp.float32)
    y2 = jax.random.normal(jax.random.fold_in(ky, 1), (b2, x2_dim), jnp.float32)
    mu2, var2 = gaussian_mlp_forward(packed, y1, y2, block_rows=8)
    mu2, var2 = jax.block_until_ready(mu2), jax.block_until_ready(var2)
    rmu2, rvar2 = _reference_forward(params_mu, params_lv, y1, y2)
    assert jnp.allclose(mu2, rmu2, atol=1e-4, rtol=1e-4)
    assert jnp.allclose(var2, rvar2, atol=1e-4, rtol=1e-4)

    print("KERNEL_OK")
</pallas_src>

<mosaic_0001>
module attributes {stable_mosaic.version = 11 : i64} {
  func.func @_gaussian_mlp_kernel(%arg0: i32, %arg1: memref<8x16xf32, #tpu.memory_space<vmem>>, %arg2: memref<8x8xf32, #tpu.memory_space<vmem>>, %arg3: memref<16x64xf32, #tpu.memory_space<vmem>>, %arg4: memref<8x64xf32, #tpu.memory_space<vmem>>, %arg5: memref<1x64xf32, #tpu.memory_space<vmem>>, %arg6: memref<64x64xf32, #tpu.memory_space<vmem>>, %arg7: memref<1x64xf32, #tpu.memory_space<vmem>>, %arg8: memref<64x128xf32, #tpu.memory_space<vmem>>, %arg9: memref<1x128xf32, #tpu.memory_space<vmem>>, %arg10: memref<8x128xf32, #tpu.memory_space<vmem>>) attributes {dimension_semantics = [#tpu.dimension_semantics<parallel>], iteration_bounds = array<i64: 1>, scalar_prefetch = 0 : i64, scratch_operands = 0 : i64, tpu.core_type = #tpu.core_type<tc>, window_params = [{transform_indices = @transform_0, window_bounds = array<i64: 8, 16>}, {transform_indices = @transform_1, window_bounds = array<i64: 8, 8>}, {pipeline_mode = #tpu.pipeline_mode<synchronous>, transform_indices = @transform_2, window_bounds = array<i64: 16, 64>}, {pipeline_mode = #tpu.pipeline_mode<synchronous>, transform_indices = @transform_3, window_bounds = array<i64: 8, 64>}, {pipeline_mode = #tpu.pipeline_mode<synchronous>, transform_indices = @transform_4, window_bounds = array<i64: 1, 64>}, {pipeline_mode = #tpu.pipeline_mode<synchronous>, transform_indices = @transform_5, window_bounds = array<i64: 64, 64>}, {pipeline_mode = #tpu.pipeline_mode<synchronous>, transform_indices = @transform_6, window_bounds = array<i64: 1, 64>}, {pipeline_mode = #tpu.pipeline_mode<synchronous>, transform_indices = @transform_7, window_bounds = array<i64: 64, 128>}, {pipeline_mode = #tpu.pipeline_mode<synchronous>, transform_indices = @transform_8, window_bounds = array<i64: 1, 128>}, {transform_indices = @transform_9, window_bounds = array<i64: 8, 128>}]} {
    %c0 = arith.constant 0 : index
    %c0_0 = arith.constant 0 : index
    %0 = vector.load %arg1[%c0, %c0_0] : memref<8x16xf32, #tpu.memory_space<vmem>>, vector<8x16xf32>
    %c0_1 = arith.constant 0 : index
    %c0_2 = arith.constant 0 : index
    %1 = vector.load %arg3[%c0_1, %c0_2] : memref<16x64xf32, #tpu.memory_space<vmem>>, vector<16x64xf32>
    %cst = arith.constant dense<0.000000e+00> : vector<8x64xf32>
    %2 = tpu.matmul %0, %1, %cst {dimension_numbers = #tpu.dot_dimension_numbers<[1], [0], [0], [1], [0, 0, 1, 1], [], []>} : vector<8x16xf32>, vector<16x64xf32>, vector<8x64xf32> -> vector<8x64xf32>
    %c0_3 = arith.constant 0 : index
    %c0_4 = arith.constant 0 : index
    %3 = vector.load %arg2[%c0_3, %c0_4] : memref<8x8xf32, #tpu.memory_space<vmem>>, vector<8x8xf32>
    %c0_5 = arith.constant 0 : index
    %c0_6 = arith.constant 0 : index
    %4 = vector.load %arg4[%c0_5, %c0_6] : memref<8x64xf32, #tpu.memory_space<vmem>>, vector<8x64xf32>
    %cst_7 = arith.constant dense<0.000000e+00> : vector<8x64xf32>
    %5 = tpu.matmul %3, %4, %cst_7 {dimension_numbers = #tpu.dot_dimension_numbers<[1], [0], [0], [1], [0, 0, 1, 1], [], []>} : vector<8x8xf32>, vector<8x64xf32>, vector<8x64xf32> -> vector<8x64xf32>
    %6 = arith.addf %2, %5 : vector<8x64xf32>
    %c0_8 = arith.constant 0 : index
    %c0_9 = arith.constant 0 : index
    %7 = vector.load %arg5[%c0_8, %c0_9] : memref<1x64xf32, #tpu.memory_space<vmem>>, vector<1x64xf32>
    %8 = vector.broadcast %7 : vector<1x64xf32> to vector<8x64xf32>
    %9 = arith.addf %6, %8 : vector<8x64xf32>
    %cst_10 = arith.constant 0.000000e+00 : f32
    %10 = vector.broadcast %cst_10 : f32 to vector<8x64xf32>
    %11 = arith.maximumf %9, %10 : vector<8x64xf32>
    %c0_11 = arith.constant 0 : index
    %c0_12 = arith.constant 0 : index
    %12 = vector.load %arg6[%c0_11, %c0_12] : memref<64x64xf32, #tpu.memory_space<vmem>>, vector<64x64xf32>
    %cst_13 = arith.constant dense<0.000000e+00> : vector<8x64xf32>
    %13 = tpu.matmul %11, %12, %cst_13 {dimension_numbers = #tpu.dot_dimension_numbers<[1], [0], [0], [1], [0, 0, 1, 1], [], []>} : vector<8x64xf32>, vector<64x64xf32>, vector<8x64xf32> -> vector<8x64xf32>
    %c0_14 = arith.constant 0 : index
    %c0_15 = arith.constant 0 : index
    %14 = vector.load %arg7[%c0_14, %c0_15] : memref<1x64xf32, #tpu.memory_space<vmem>>, vector<1x64xf32>
    %15 = vector.broadcast %14 : vector<1x64xf32> to vector<8x64xf32>
    %16 = arith.addf %13, %15 : vector<8x64xf32>
    %cst_16 = arith.constant 0.000000e+00 : f32
    %17 = vector.broadcast %cst_16 : f32 to vector<8x64xf32>
    %18 = arith.maximumf %16, %17 : vector<8x64xf32>
    %c0_17 = arith.constant 0 : index
    %c0_18 = arith.constant 0 : index
    %19 = vector.load %arg8[%c0_17, %c0_18] : memref<64x128xf32, #tpu.memory_space<vmem>>, vector<64x128xf32>
    %cst_19 = arith.constant dense<0.000000e+00> : vector<8x128xf32>
    %20 = tpu.matmul %18, %19, %cst_19 {dimension_numbers = #tpu.dot_dimension_numbers<[1], [0], [0], [1], [0, 0, 1, 1], [], []>} : vector<8x64xf32>, vector<64x128xf32>, vector<8x128xf32> -> vector<8x128xf32>
    %c0_20 = arith.constant 0 : index
    %c0_21 = arith.constant 0 : index
    %21 = vector.load %arg9[%c0_20, %c0_21] : memref<1x128xf32, #tpu.memory_space<vmem>>, vector<1x128xf32>
    %22 = vector.broadcast %21 : vector<1x128xf32> to vector<8x128xf32>
    %23 = arith.addf %20, %22 : vector<8x128xf32>
    %24 = tpu.iota {dimensions = array<i32: 1>} : vector<8x128xi32>
    %c8_i32 = arith.constant 8 : i32
    %25 = vector.broadcast %c8_i32 : i32 to vector<8x128xi32>
    %26 = arith.cmpi sge, %24, %25 : vector<8x128xi32>
    %c16_i32 = arith.constant 16 : i32
    %27 = vector.broadcast %c16_i32 : i32 to vector<8x128xi32>
    %28 = arith.cmpi slt, %24, %27 : vector<8x128xi32>
    %29 = arith.andi %26, %28 : vector<8x128xi1>
    %cst_22 = arith.constant 0.000000e+00 : f32
    %30 = vector.broadcast %cst_22 : f32 to vector<8x128xf32>
    %31 = arith.maximumf %23, %30 : vector<8x128xf32>
    %32 = math.absf %23 : vector<8x128xf32>
    %cst_23 = arith.constant 0.000000e+00 : f32
    %33 = vector.broadcast %cst_23 : f32 to vector<8x128xf32>
    %34 = arith.subf %33, %32 : vector<8x128xf32>
    %35 = math.exp %34 : vector<8x128xf32>
    %36 = math.log1p %35 : vector<8x128xf32>
    %37 = arith.addf %31, %36 : vector<8x128xf32>
    %38 = arith.select %29, %37, %23 : vector<8x128xi1>, vector<8x128xf32>
    %c0_24 = arith.constant 0 : index
    %c0_25 = arith.constant 0 : index
    %39 = vector.load %arg10[%c0_24, %c0_25] : memref<8x128xf32, #tpu.memory_space<vmem>>, vector<8x128xf32>
    tpu.vector_store %arg10[%c0_24, %c0_25], %38 {strides = array<i32>} : memref<8x128xf32, #tpu.memory_space<vmem>>, vector<8x128xf32>,
    return
  }
  func.func @transform_0(%arg0: i32) -> (i32, i32) {
    %c0_i32 = arith.constant 0 : i32
    %c0_i32_0 = arith.constant 0 : i32
    return %arg0, %c0_i32 : i32, i32
  }
  func.func @transform_1(%arg0: i32) -> (i32, i32) {
    %c0_i32 = arith.constant 0 : i32
    %c0_i32_0 = arith.constant 0 : i32
    return %arg0, %c0_i32 : i32, i32
  }
  func.func @transform_2(%arg0: i32) -> (i32, i32) {
    %c0_i32 = arith.constant 0 : i32
    %c0_i32_0 = arith.constant 0 : i32
    %c0_i32_1 = arith.constant 0 : i32
    return %c0_i32, %c0_i32_0 : i32, i32
  }
  func.func @transform_3(%arg0: i32) -> (i32, i32) {
    %c0_i32 = arith.constant 0 : i32
    %c0_i32_0 = arith.constant 0 : i32
    %c0_i32_1 = arith.constant 0 : i32
    return %c0_i32, %c0_i32_0 : i32, i32
  }
  func.func @transform_4(%arg0: i32) -> (i32, i32) {
    %c0_i32 = arith.constant 0 : i32
    %c0_i32_0 = arith.constant 0 : i32
    %c0_i32_1 = arith.constant 0 : i32
    return %c0_i32, %c0_i32_0 : i32, i32
  }
  func.func @transform_5(%arg0: i32) -> (i32, i32) {
    %c0_i32 = arith.constant 0 : i32
    %c0_i32_0 = arith.constant 0 : i32
    %c0_i32_1 = arith.constant 0 : i32
    return %c0_i32, %c0_i32_0 : i32, i32
  }
  func.func @transform_6(%arg0: i32) -> (i32, i32) {
    %c0_i32 = arith.constant 0 : i32
    %c0_i32_0 = arith.constant 0 : i32
    %c0_i32_1 = arith.constant 0 : i32
    return %c0_i32, %c0_i32_0 : i32, i32
  }
  func.func @transform_7(%arg0: i32) -> (i32, i32) {
    %c0_i32 = arith.constant 0 : i32
    %c0_i32_0 = arith.constant 0 : i32
    %c0_i32_1 = arith.constant 0 : i32
    return %c0_i32, %c0_i32_0 : i32, i32
  }
  func.func @transform_8(%arg0: i32) -> (i32, i32) {
    %c0_i32 = arith.constant 0 : i32
    %c0_i32_0 = arith.constant 0 : i32
    %c0_i32_1 = arith.constant 0 : i32
    return %c0_i32, %c0_i32_0 : i32, i32
  }
  func.func @transform_9(%arg0: i32) -> (i32, i32) {
    %c0_i32 = arith.constant 0 : i32
    %c0_i32_0 = arith.constant 0 : i32
    return %arg0, %c0_i32 : i32, i32
  }
}

</mosaic_0001>

<bundles_post_ra>
// kernel: tpu_custom_call.1
= control target key start
LH: loop header
LB: loop body
LE: loop exit
PB: predicated region body
PF: predicated region fallthrough
CT: control target
= control target key end

     0   :  { %14 = vsyncpa [#allocation3], 0  ;;  %s581_s0 = inlined_call_operand.hbm [shape: f32[8,16], index: 0, kind: input, shape index: {}]   ;;  %s582_s1 = inlined_call_operand.hbm [shape: f32[8,8], index: 1, kind: input, shape index: {}]   ;;  %s583_s2 = inlined_call_operand.hbm [shape: f32[16,64], index: 2, kind: input, shape index: {}]   ;;  %s584_s3 = inlined_call_operand.hbm [shape: f32[8,64], index: 3, kind: input, shape index: {}]   ;;  %s585_s4 = inlined_call_operand.vmem [shape: f32[1,64], index: 4, kind: input, shape index: {}]   ;;  %s586_s5 = inlined_call_operand.hbm [shape: f32[64,64], index: 5, kind: input, shape index: {}]   ;;  %s587_s6 = inlined_call_operand.vmem [shape: f32[1,64], index: 6, kind: input, shape index: {}]   ;;  %s588_s7 = inlined_call_operand.hbm [shape: f32[64,128], index: 7, kind: input, shape index: {}]   ;;  %s589_s8 = inlined_call_operand.vmem [shape: f32[1,128], index: 8, kind: input, shape index: {}]   ;;  %s590_s9 = inlined_call_operand.hbm [shape: f32[8,128], index: 9, kind: output, shape index: {}]  }
   0x1   :  { %15 = vsyncpa [#allocation6], 0 }
   0x2   :  { %16 = vsyncpa [#allocation9], 0 }
   0x3   :  { %17 = vsyncpa [#allocation12], 0  ;;  %s35_s11 = sshll.u32 %s582_s1, 4  ;;  %s36_s11 = int_to_ptr.hbm [resolvable:$true] %s35_s11 }
   0x4   :  { %18 = vsyncpa [#allocation4], 0  ;;  %s492_s12 = smov [#allocation5]   ;;  %s59_s16 = sshll.u32 %s584_s3, 4  ;;  %s60_s16 = int_to_ptr.hbm [resolvable:$true] %s59_s16 }
   0x5   :  { %s37_s13 = sshll.u32 %s492_s12, 4  ;;  %s493_s17 = smov [#allocation8]   ;;  %s38_s13 = int_to_ptr.vmem [resolvable:$true] %s37_s13 }
   0x6   :  { %40 = dma.hbm_to_vmem [thread:$0]  %s36_s11, 128, %s38_s13, [#allocation6]  }
   0x7   :  { %s61_s18 = sshll.u32 %s493_s17, 4  ;;  %s24_s21 = sshll.u32 %s581_s0, 4  ;;  %s62_s18 = int_to_ptr.vmem [resolvable:$true] %s61_s18  ;;  %s25_s21 = int_to_ptr.hbm [resolvable:$true] %s24_s21 }
   0x8   :  { %64 = dma.hbm_to_vmem [thread:$0]  %s60_s16, 128, %s62_s18, [#allocation9]  }
   0x9   :  { %s45_s23 = sshll.u32 %s583_s2, 4  ;;  %s494_s24 = smov [#allocation2]   ;;  %s46_s23 = int_to_ptr.hbm [resolvable:$true] %s45_s23 }
   0xa   :  { %s26_s25 = sshll.u32 %s494_s24, 4  ;;  %s495_s3 = smov [#allocation7]   ;;  %s27_s25 = int_to_ptr.vmem [resolvable:$true] %s26_s25 }
   0xb   :  { %29 = dma.hbm_to_vmem [thread:$0]  %s25_s21, 128, %s27_s25, [#allocation3]  }
   0xc   :  { %s47_s26 = sshll.u32 %s495_s3, 4  ;;  %s496_s27 = smov 128   ;;  %s48_s26 = int_to_ptr.vmem [resolvable:$true] %s47_s26 }
   0xd   :  { %s497_s28 = smov 8   ;;  %s71_s30 = sshll.u32 %s586_s5, 4  ;;  %s72_s30 = int_to_ptr.hbm [resolvable:$true] %s71_s30 }
   0xe   :  { %53 = dma.hbm_to_vmem [thread:$0]  %s46_s23, 256, %s48_s26, [#allocation6], %s496_s27, %s496_s27, %s497_s28  }
   0xf   :  { %s498_s10 = smov [#allocation10]   ;;  %s86_s13 = sshll.u32 %s588_s7, 4  ;;  %s87_s13 = int_to_ptr.hbm [resolvable:$true] %s86_s13 }
  0x10   :  { %s73_s11 = sshll.u32 %s498_s10, 4  ;;  %s499_s14 = smov [#allocation11]   ;;  %s74_s11 = int_to_ptr.vmem [resolvable:$true] %s73_s11 }
  0x11   :  { %79 = dma.hbm_to_vmem [thread:$0]  %s72_s30, 1024, %s74_s11, [#allocation9], %s496_s27, %s496_s27, %s497_s28  }
  0x12   :  { %s88_s15 = sshll.u32 %s499_s14, 4  ;;  %s89_s15 = int_to_ptr.vmem [resolvable:$true] %s88_s15 }
  0x13   :  { %94 = dma.hbm_to_vmem [thread:$0]  %s87_s13, 1024, %s89_s15, [#allocation12], %s496_s27, %s496_s27, %s497_s28  }
  0x14   :  { %482 = dma.done.wait [#allocation3], 128  }
  0x15   :  { %483 = vsyncadd [#allocation3], 4294967168 }
  0x16   :  { %484 = dma.done.wait [#allocation6], 384  }
  0x17   :  { %485 = vsyncadd [#allocation6], 4294966912 }
  0x18   :  { %486 = dma.done.wait [#allocation9], 1152  }
  0x19   :  { %487 = vsyncadd [#allocation9], 4294966144 }
  0x1a   :  { %488 = dma.done.wait [#allocation12], 1024  }
  0x1b   :  { %489 = vsyncadd [#allocation12], 4294966272  ;;  %vm126_vm0 = vcmask 64512   ;;  %v123_v0 = vld [vmem:[#allocation7 + $0x8] sm:$0xff]  ;;  %v125_v1 = vld [vmem:[#allocation8] sm:$0xff]  ;;  %vm150_vm1 = vcmask 130048   ;;  %v252_v39 = vlaneseq }
  0x1c   :  { %v122_v2 = vld [vmem:[#allocation7] sm:$0xff]  ;;  %168 = vmatpush.msra.mxu1 %v123_v0  ;;  %145 = vmatpush.msra.mxu0 %v125_v1  ;;  %v124_v3 = vld [vmem:[#allocation5] sm:$0xff]  ;;  %v121_v4 = vld [vmem:[#allocation2] sm:$0xff]  ;;  %vm192_vm2 = vcmask 523264   ;;  %s281_s21 = sshll.u32 %s590_s9, 4  ;;  %s282_s21 = int_to_ptr.hbm [resolvable:$true] %s281_s21 }
  0x1d   :  { %v187_v5 = vld [vmem:[#allocation10 + $0x38] sm:$0xff]  ;;  %294 = vmatmul.msk.f32.vlgmr.msra.gmra.mxu0 %vm126_vm0, %v124_v3  ;;  %v186_v6 = vld [vmem:[#allocation10 + $0x30] sm:$0xff]  ;;  %v185_v7 = vld [vmem:[#allocation10 + $0x28] sm:$0xff]  ;;  %v253_v41 = vand.u32 127, %v252_v39 }
  0x1e   :  { %204 = vmatpush.msra.mxu2 %v187_v5  ;;  %169 = vmatpush.msra.mxu1 %v122_v2  ;;  %v184_v8 = vld [vmem:[#allocation10 + $0x20] sm:$0xff]  ;;  %v183_v9 = vld [vmem:[#allocation10 + $0x18] sm:$0xff]  ;;  %v182_v10 = vld [vmem:[#allocation10 + $0x10] sm:$0xff] }
  0x1f   :  { %295 = vmatmul.msk.f32.vlgmr.msra.gmra.mxu1 %vm150_vm1, %v121_v4  ;;  %v181_v11 = vld [vmem:[#allocation10 + $0x8] sm:$0xff]  ;;  %v180_v12 = vld [vmem:[#allocation10] sm:$0xff]  ;;  %v224_v13 = vld [vmem:[#allocation11 + $0x38] sm:$0xff]  ;;  %vm254_vm3 = vcmp.ge.s32.totalorder %v253_v41, 8  ;;  %vm255_vm4 = vcmp.lt.s32.totalorder %v253_v41, 16 }
  0x20   :  { %205 = vmatpush.msra.mxu2 %v186_v6  ;;  %v223_v14 = vld [vmem:[#allocation11 + $0x30] sm:$0xff]  ;;  %240 = vmatpush.msra.mxu3 %v224_v13  ;;  %v222_v15 = vld [vmem:[#allocation11 + $0x28] sm:$0xff]  ;;  %v221_v16 = vld [vmem:[#allocation11 + $0x20] sm:$0xff] }
  0x21   :  { %v220_v17 = vld [vmem:[#allocation11 + $0x18] sm:$0xff]  ;;  %v219_v24 = vld [vmem:[#allocation11 + $0x10] sm:$0xff]  ;;  %v218_v25 = vld [vmem:[#allocation11 + $0x8] sm:$0xff] }
  0x22   :  { %206 = vmatpush.msra.mxu2 %v185_v7  ;;  %241 = vmatpush.msra.mxu3 %v223_v14  ;;  %v307_v19 = vld [vmem:[%s585_s4] ss:$0 sm:$0xff]  ;;  %v217_v26 = vld [vmem:[#allocation11] sm:$0xff]  ;;  %vm256_vm6 = vmand %vm254_vm3, %vm255_vm4 }
  0x23   :  { %v308_v27 = vld [vmem:[%s587_s6] ss:$0 sm:$0xff]  ;;  %s500_s6 = smov [#allocation13]  }
  0x24   :  { %207 = vmatpush.msra.mxu2 %v184_v8  ;;  %242 = vmatpush.msra.mxu3 %v222_v15  ;;  %v309_v31 = vld [vmem:[%s589_s8] ss:$0 sm:$0xff]  ;;  %s279_s8 = sshll.u32 %s500_s6, 4  ;;  %s280_s8 = int_to_ptr.vmem [resolvable:$true] %s279_s8 }
  0x26   :  { %208 = vmatpush.msra.mxu2 %v183_v9  ;;  %243 = vmatpush.msra.mxu3 %v221_v16 }
  0x28   :  { %209 = vmatpush.msra.mxu2 %v182_v10  ;;  %244 = vmatpush.msra.mxu3 %v220_v17 }
  0x2a   :  { %210 = vmatpush.msra.mxu2 %v181_v11  ;;  %245 = vmatpush.msra.mxu3 %v219_v24 }
  0x2c   :  { %211 = vmatpush.msra.mxu2 %v180_v12  ;;  %246 = vmatpush.msra.mxu3 %v218_v25 }
  0x2e   :  { %247 = vmatpush.msra.mxu3 %v217_v26 }
  0x9a   :  { %v147_v18 = vpop.f32.mrf.mxu0 }
  0x9c   :  { %v171_v20 = vpop.f32.mrf.mxu1 }
  0x9d   :  { %v172_v21 = vadd.f32 %v171_v20, %v147_v18 }
  0x9f   :  { %v178_v22 = vadd.f32 %v307_v19, %v172_v21 }
  0xa1   :  { %v179_v23 = vmax.f32 %v178_v22, 0.0 }
  0xa3   :  { %296 = vmatmul.msk.f32.vlgmr.msra.gmra.mxu2 %vm192_vm2, %v179_v23 }
 0x126   :  { %v213_v28 = vpop.f32.mrf.mxu2 }
 0x127   :  { %v214_v29 = vadd.f32 %v308_v27, %v213_v28 }
 0x129   :  { %v216_v30 = vmax.f32 %v214_v29, 0.0 }
 0x12b   :  { %297 = vmatmul.msk.f32.vlgmr.msra.gmra.mxu3 %vm192_vm2, %v216_v30 }
 0x1ae   :  { %v249_v32 = vpop.f32.mrf.mxu3 }
 0x1af   :  { %v250_v33 = vadd.f32 %v309_v31, %v249_v32 }
 0x1b1   :  { %v258_v34 = vand.u32 2147483647, %v250_v33  ;;  %v257_v47 = vmax.f32 %v250_v33, 0.0 }
 0x1b3   :  { %v259_v35 = vsub.f32 0.0, %v258_v34 }
 0x1b5   :  { %v260_v36 = vmul.f32 1.442695, %v259_v35 }
 0x1b7   :  { %310 = vpow2.f32 %v260_v36 }
 0x1bd   :  { %v311_v37 = vpop.eup %310 }
 0x1be   :  { %v262_v38 = vadd.f32 1.0, %v311_v37  ;;  %v265_v40 = vmul.f32 -0.5, %v311_v37  ;;  %v268_v43 = vand.u32 2147483647, %v311_v37 }
 0x1c0   :  { %312 = vlog2.f32 %v262_v38  ;;  %v266_v42 = vadd.f32 1.0, %v265_v40  ;;  %vm269_vm5 = vcmp.lt.f32.partialorder %v268_v43, 0.0004427343 }
 0x1c2   :  { %v267_v46 = vmul.f32 %v311_v37, %v266_v42 }
 0x1c6   :  { %v313_v44 = vpop.eup %312 }
 0x1c7   :  { %v264_v45 = vmul.f32 0.6931472, %v313_v44 }
 0x1c9   :  { %v270_v48 = vsel %vm269_vm5, %v267_v46, %v264_v45 }
 0x1ca   :  { %v271_v49 = vadd.f32 %v270_v48, %v257_v47 }
 0x1cc   :  { %v272_v50 = vsel %vm256_vm6, %v271_v49, %v250_v33 }
 0x1cd   :  { %273 = vst [vmem:[#allocation13] sm:$0xff] %v272_v50 }
 0x1ce   :  { %284 = dma.vmem_to_hbm [thread:$0]  %s280_s8, 128, %s282_s21, [#allocation4]  }
 0x1cf   :  { %490 = dma.done.wait [#allocation4], 128  }
 0x1d0   :  { %491 = vsyncadd [#allocation4], 4294967168 }
 0x1d1   :  { %289 = vsyncpa [#allocation3], 1 }
 0x1d2   :  { %290 = vsyncpa [#allocation6], 1 }
 0x1d3   :  { %291 = vsyncpa [#allocation9], 1 }
 0x1d4   :  { %292 = vsyncpa [#allocation12], 1 }
 0x1d5   :  { %293 = vsyncpa [#allocation4], 1 }

</bundles_post_ra>
